<compile_context>
chip_gen: v6e
topology: v6e:2x2x1
jax: 0.10.0
libtpu: 0.0.40
codegen_flags: <defaults>
</compile_context>

<pallas_src>
import functools

import jax
import jax.numpy as jnp
from jax.experimental import pallas as pl
from jax.experimental.pallas import tpu as pltpu


# ------------------------------ fused kernel --------------------------------

def gin_forward_kernel(adj_ref, x_ref, noise_ref,
                       w_conv_ref, b_conv_ref,
                       w_heads_ref, b_heads_ref,
                       w_dec_ref, b_dec_ref,
                       out_ref, *, num_conv, latent, src_chunk):
    neg_big = jnp.float32(-3.0e38)

    # ---- adjacency preprocessing: done ONCE, reused by every aggregation ----
    adj = adj_ref[...].astype(jnp.int32)                    # (N, N) adj[dst, src]
    edge = adj > 0                                          # bool   (N, N)
    # Additive mask: 0 where edge, -3e38 where not (add+max instead of select).
    add_mask = jnp.where(edge, jnp.float32(0.0), neg_big)   # (N, N) f32
    # Row has at least one incoming edge <=> its max additive mask is 0.
    has_nb = jnp.max(add_mask, axis=-1, keepdims=True) >= jnp.float32(0.0)  # (N,1)

    n_dst, n_src = add_mask.shape
    n_chunks = pl.cdiv(n_src, src_chunk)                    # static

    def max_aggregate(feat):
        # agg[dst, f] = max over src with adj[dst, src] > 0 of feat[src, f].
        # Src axis is walked in chunks with an (N, F) running max; the big
        # (N, N, F) broadcast is never materialized.
        run = jnp.full((n_dst, feat.shape[1]), neg_big, jnp.float32)
        for c in range(n_chunks):                           # static chunk loop
            lo = c * src_chunk
            hi = min(lo + src_chunk, n_src)
            m = add_mask[:, lo:hi]                          # (N, S)
            f = feat[lo:hi, :]                              # (S, F)
            cand = jnp.max(m[:, :, None] + f[None, :, :], axis=1)  # (N, F)
            run = jnp.maximum(run, cand)
        # Zero-in-degree rows aggregate 0 (never hit when self-loops exist).
        return jnp.where(has_nb, run, jnp.float32(0.0))

    def affine(h, w, b):
        return jnp.dot(h, w, preferred_element_type=jnp.float32) + b

    # ------------------------------ GIN conv stack ---------------------------
    x = x_ref[...]                                          # (N, F)
    for i in range(num_conv):                               # static layer loop
        h = x + max_aggregate(x)                            # (1+eps)*x + max, eps=0
        x = jnp.tanh(affine(h, w_conv_ref[i], b_conv_ref[i]))
        # Dropout(p=0) is the identity.

    # --------- fused q_z_mean / q_z_std heads (shared h, one wide dot) -------
    h = x + max_aggregate(x)                                # computed once
    heads = affine(h, w_heads_ref[...], b_heads_ref[...])   # (N, 2*latent)
    m = heads[:, :latent]                                   # q_z_mean
    s = jnp.maximum(heads[:, latent:], jnp.float32(0.0)) + jnp.float32(1e-4)

    # ----------------------- reparameterize + decoder ------------------------
    z = noise_ref[...] * s + m
    z = affine(z, w_dec_ref[...], b_dec_ref[...])

    # Single lane-contiguous packed store: [z | m | s], split in the wrapper.
    out_ref[...] = jnp.concatenate([z, m, s], axis=-1)


def multi_layer_gin_forward(params, adj, x, noise, *, src_chunk=8):
    """Fused forward. Returns (z, m_q_z, std_q_z)."""
    conv = params["conv_layers"]
    num_conv = len(conv)
    n, in_feature = x.shape
    latent = params["q_z_mean"][0].shape[1]

    # The reference module only type-checks when in_feature == latent_dim
    # (every GINConv Linear is (in_feature -> latent_dim)).
    assert in_feature == latent, "multi_layer_GIN requires in_feature == latent_dim"

    # Stacked per-layer weights: 2 refs instead of 2*num_conv tiny refs.
    w_conv = jnp.stack([w for w, _ in conv])                 # (num_conv, F, L)
    b_conv = jnp.stack([b for _, b in conv])                 # (num_conv, 1, L)
    # Fused mean/std head weights: one (F, 2L) dot instead of two (F, L) dots.
    w_heads = jnp.concatenate([params["q_z_mean"][0], params["q_z_std"][0]], axis=1)
    b_heads = jnp.concatenate([params["q_z_mean"][1], params["q_z_std"][1]], axis=1)
    w_dec, b_dec = params["generate_z"]

    # Adjacency travels as int8 (4x less HBM traffic / VMEM than f32).
    adj_i8 = adj.astype(jnp.int8)

    vmem = pl.BlockSpec(memory_space=pltpu.MemorySpace.VMEM)
    kernel = functools.partial(gin_forward_kernel, num_conv=num_conv,
                               latent=latent, src_chunk=src_chunk)

    packed = pl.pallas_call(
        kernel,
        in_specs=[vmem] * 9,
        out_specs=vmem,
        out_shape=jax.ShapeDtypeStruct((n, 3 * latent), jnp.float32),
    )(adj_i8, x, noise, w_conv, b_conv, w_heads, b_heads, w_dec, b_dec)

    z = packed[:, :latent]
    m_q_z = packed[:, latent:2 * latent]
    std_q_z = packed[:, 2 * latent:]
    return z, m_q_z, std_q_z


# ------------------------------- parameters ---------------------------------

def init_linear(key, in_f, out_f):
    """torch.nn.Linear-style init; weight stored already transposed (in, out)."""
    kw, kb = jax.random.split(key)
    bound = 1.0 / float(in_f) ** 0.5
    w = jax.random.uniform(kw, (in_f, out_f), jnp.float32, -bound, bound)
    b = jax.random.uniform(kb, (1, out_f), jnp.float32, -bound, bound)
    return w, b


def build_params(key, in_feature, latent_dim, layers):
    # Mirrors multi_layer_GIN.__init__: every GINConv apply_func is
    # Linear(in_feature, latent_dim); `layers` only determines the number of
    # conv layers.
    num_conv = len(layers)          # == len([in_feature] + layers) - 1
    keys = jax.random.split(key, num_conv + 3)
    conv_layers = [init_linear(keys[i], in_feature, latent_dim)
                   for i in range(num_conv)]
    q_z_mean = init_linear(keys[num_conv], in_feature, latent_dim)
    q_z_std = init_linear(keys[num_conv + 1], in_feature, latent_dim)
    generate_z = init_linear(keys[num_conv + 2], latent_dim, latent_dim)
    return dict(conv_layers=conv_layers, q_z_mean=q_z_mean,
                q_z_std=q_z_std, generate_z=generate_z)


# ---------------------------- pure-JAX reference -----------------------------

def reference_forward(params, adj, x, noise):
    nb = adj > 0
    has_nb = jnp.any(nb, axis=-1, keepdims=True)

    def agg(feat):
        masked = jnp.where(nb[:, :, None], feat[None, :, :], -jnp.inf)
        a = jnp.max(masked, axis=1)
        return jnp.where(has_nb, a, 0.0)

    def conv(feat, wb):
        w, b = wb
        return (feat + agg(feat)) @ w + b

    for wb in params["conv_layers"]:
        x = jnp.tanh(conv(x, wb))
    m = conv(x, params["q_z_mean"])
    s = jnp.maximum(conv(x, params["q_z_std"]), 0.0) + 1e-4
    z = noise * s + m
    wd, bd = params["generate_z"]
    z = z @ wd + bd
    return z, m, s


# ---------------------------------- main -------------------------------------

if __name__ == "__main__":
    key = jax.random.PRNGKey(0)
    k_adj, k_x, k_params, k_eps = jax.random.split(key, 4)

    # Small shapes consistent with the module. in_feature must equal
    # latent_dim for the reference module's forward to type-check.
    N = 8
    in_feature = 32
    latent_dim = 32
    layers = [64]          # -> 1 GIN conv layer (module default)

    # Dense adjacency adj[dst, src] with self-loops (guarantees >=1 neighbor),
    # shipped as int8.
    adj = (jax.random.uniform(k_adj, (N, N)) < 0.4).astype(jnp.int8)
    adj = jnp.maximum(adj, jnp.eye(N, dtype=jnp.int8))

    x = jax.random.normal(k_x, (N, in_feature), dtype=jnp.float32)

    # torch.randn_like(std) inside reparameterize -> supplied deterministically.
    noise = jax.random.normal(k_eps, (N, latent_dim), dtype=jnp.float32)

    params = build_params(k_params, in_feature, latent_dim, layers)

    z, m_q_z, std_q_z = multi_layer_gin_forward(params, adj, x, noise)
    jax.block_until_ready((z, m_q_z, std_q_z))

    # Shape / sanity checks.
    assert z.shape == (N, latent_dim)
    assert m_q_z.shape == (N, latent_dim)
    assert std_q_z.shape == (N, latent_dim)
    assert bool(jnp.all(std_q_z >= 1e-4 * 0.99))
    assert bool(jnp.all(jnp.isfinite(z)))

    # Numerical check against a pure-JAX reference.
    z_ref, m_ref, s_ref = reference_forward(params, adj, x, noise)
    assert bool(jnp.allclose(m_q_z, m_ref, atol=1e-2, rtol=1e-2))
    assert bool(jnp.allclose(std_q_z, s_ref, atol=1e-2, rtol=1e-2))
    assert bool(jnp.allclose(z, z_ref, atol=1e-2, rtol=1e-2))

    print("KERNEL_OK")
</pallas_src>

<mosaic_0001>
module attributes {stable_mosaic.version = 11 : i64} {
  func.func @gin_forward_kernel(%arg0: memref<8x8xi8, #tpu.memory_space<vmem>>, %arg1: memref<8x32xf32, #tpu.memory_space<vmem>>, %arg2: memref<8x32xf32, #tpu.memory_space<vmem>>, %arg3: memref<1x32x32xf32, #tpu.memory_space<vmem>>, %arg4: memref<1x1x32xf32, #tpu.memory_space<vmem>>, %arg5: memref<32x64xf32, #tpu.memory_space<vmem>>, %arg6: memref<1x64xf32, #tpu.memory_space<vmem>>, %arg7: memref<32x32xf32, #tpu.memory_space<vmem>>, %arg8: memref<1x32xf32, #tpu.memory_space<vmem>>, %arg9: memref<8x96xf32, #tpu.memory_space<vmem>>) attributes {dimension_semantics = [], scalar_prefetch = 0 : i64, scratch_operands = 0 : i64, tpu.core_type = #tpu.core_type<tc>} {
    %c0 = arith.constant 0 : index
    %c0_0 = arith.constant 0 : index
    %0 = vector.load %arg0[%c0, %c0_0] : memref<8x8xi8, #tpu.memory_space<vmem>>, vector<8x8xi8>
    %1 = arith.extsi %0 : vector<8x8xi8> to vector<8x8xi32>
    %c0_i32 = arith.constant 0 : i32
    %2 = vector.broadcast %c0_i32 : i32 to vector<8x8xi32>
    %3 = arith.cmpi sgt, %1, %2 : vector<8x8xi32>
    %cst = arith.constant 0.000000e+00 : f32
    %cst_1 = arith.constant -3.000000e+38 : f32
    %4 = vector.broadcast %cst : f32 to vector<8x8xf32>
    %5 = vector.broadcast %cst_1 : f32 to vector<8x8xf32>
    %6 = arith.select %3, %4, %5 : vector<8x8xi1>, vector<8x8xf32>
    %cst_2 = arith.constant dense<0xFF800000> : vector<8xf32>
    %7 = vector.multi_reduction <maximumf>, %6, %cst_2 [1] : vector<8x8xf32> to vector<8xf32>
    %8 = vector.shape_cast %7 : vector<8xf32> to vector<8x1xf32>
    %cst_3 = arith.constant 0.000000e+00 : f32
    %9 = vector.broadcast %cst_3 : f32 to vector<8x1xf32>
    %10 = arith.cmpf oge, %8, %9 : vector<8x1xf32>
    %c0_4 = arith.constant 0 : index
    %c0_5 = arith.constant 0 : index
    %11 = vector.load %arg1[%c0_4, %c0_5] : memref<8x32xf32, #tpu.memory_space<vmem>>, vector<8x32xf32>
    %cst_6 = arith.constant -3.000000e+38 : f32
    %12 = vector.broadcast %cst_6 : f32 to vector<8x32xf32>
    %13 = vector.shape_cast %6 : vector<8x8xf32> to vector<8x8x1xf32>
    %14 = vector.shape_cast %11 : vector<8x32xf32> to vector<1x8x32xf32>
    %15 = vector.broadcast %13 : vector<8x8x1xf32> to vector<8x8x32xf32>
    %16 = vector.broadcast %14 : vector<1x8x32xf32> to vector<8x8x32xf32>
    %17 = arith.addf %15, %16 : vector<8x8x32xf32>
    %cst_7 = arith.constant dense<0xFF800000> : vector<8x32xf32>
    %18 = vector.multi_reduction <maximumf>, %17, %cst_7 [1] : vector<8x8x32xf32> to vector<8x32xf32>
    %19 = arith.maximumf %12, %18 : vector<8x32xf32>
    %cst_8 = arith.constant 0.000000e+00 : f32
    %20 = vector.shape_cast %10 : vector<8x1xi1> to vector<8x1xi1>
    %21 = vector.broadcast %20 : vector<8x1xi1> to vector<8x32xi1>
    %22 = vector.broadcast %cst_8 : f32 to vector<8x32xf32>
    %23 = arith.select %21, %19, %22 : vector<8x32xi1>, vector<8x32xf32>
    %24 = arith.addf %11, %23 : vector<8x32xf32>
    %c0_9 = arith.constant 0 : index
    %c0_10 = arith.constant 0 : index
    %c0_11 = arith.constant 0 : index
    %25 = vector.load %arg3[%c0_9, %c0_10, %c0_11] : memref<1x32x32xf32, #tpu.memory_space<vmem>>, vector<1x32x32xf32>
    %26 = vector.shape_cast %25 : vector<1x32x32xf32> to vector<32x32xf32>
    %c0_12 = arith.constant 0 : index
    %c0_13 = arith.constant 0 : index
    %c0_14 = arith.constant 0 : index
    %27 = vector.load %arg4[%c0_12, %c0_13, %c0_14] : memref<1x1x32xf32, #tpu.memory_space<vmem>>, vector<1x1x32xf32>
    %28 = vector.shape_cast %27 : vector<1x1x32xf32> to vector<1x32xf32>
    %cst_15 = arith.constant dense<0.000000e+00> : vector<8x32xf32>
    %29 = tpu.matmul %24, %26, %cst_15 {dimension_numbers = #tpu.dot_dimension_numbers<[1], [0], [0], [1], [0, 0, 1, 1], [], []>} : vector<8x32xf32>, vector<32x32xf32>, vector<8x32xf32> -> vector<8x32xf32>
    %30 = vector.broadcast %28 : vector<1x32xf32> to vector<8x32xf32>
    %31 = arith.addf %29, %30 : vector<8x32xf32>
    %32 = math.tanh %31 : vector<8x32xf32>
    %cst_16 = arith.constant -3.000000e+38 : f32
    %33 = vector.broadcast %cst_16 : f32 to vector<8x32xf32>
    %34 = vector.shape_cast %6 : vector<8x8xf32> to vector<8x8x1xf32>
    %35 = vector.shape_cast %32 : vector<8x32xf32> to vector<1x8x32xf32>
    %36 = vector.broadcast %34 : vector<8x8x1xf32> to vector<8x8x32xf32>
    %37 = vector.broadcast %35 : vector<1x8x32xf32> to vector<8x8x32xf32>
    %38 = arith.addf %36, %37 : vector<8x8x32xf32>
    %cst_17 = arith.constant dense<0xFF800000> : vector<8x32xf32>
    %39 = vector.multi_reduction <maximumf>, %38, %cst_17 [1] : vector<8x8x32xf32> to vector<8x32xf32>
    %40 = arith.maximumf %33, %39 : vector<8x32xf32>
    %cst_18 = arith.constant 0.000000e+00 : f32
    %41 = vector.shape_cast %10 : vector<8x1xi1> to vector<8x1xi1>
    %42 = vector.broadcast %41 : vector<8x1xi1> to vector<8x32xi1>
    %43 = vector.broadcast %cst_18 : f32 to vector<8x32xf32>
    %44 = arith.select %42, %40, %43 : vector<8x32xi1>, vector<8x32xf32>
    %45 = arith.addf %32, %44 : vector<8x32xf32>
    %c0_19 = arith.constant 0 : index
    %c0_20 = arith.constant 0 : index
    %46 = vector.load %arg5[%c0_19, %c0_20] : memref<32x64xf32, #tpu.memory_space<vmem>>, vector<32x64xf32>
    %c0_21 = arith.constant 0 : index
    %c0_22 = arith.constant 0 : index
    %47 = vector.load %arg6[%c0_21, %c0_22] : memref<1x64xf32, #tpu.memory_space<vmem>>, vector<1x64xf32>
    %cst_23 = arith.constant dense<0.000000e+00> : vector<8x64xf32>
    %48 = tpu.matmul %45, %46, %cst_23 {dimension_numbers = #tpu.dot_dimension_numbers<[1], [0], [0], [1], [0, 0, 1, 1], [], []>} : vector<8x32xf32>, vector<32x64xf32>, vector<8x64xf32> -> vector<8x64xf32>
    %49 = vector.broadcast %47 : vector<1x64xf32> to vector<8x64xf32>
    %50 = arith.addf %48, %49 : vector<8x64xf32>
    %51 = vector.extract_strided_slice %50 {offsets = [0, 0], sizes = [8, 32], strides = [1, 1]} : vector<8x64xf32> to vector<8x32xf32>
    %52 = vector.extract_strided_slice %50 {offsets = [0, 32], sizes = [8, 32], strides = [1, 1]} : vector<8x64xf32> to vector<8x32xf32>
    %cst_24 = arith.constant 0.000000e+00 : f32
    %53 = vector.broadcast %cst_24 : f32 to vector<8x32xf32>
    %54 = arith.maximumf %52, %53 : vector<8x32xf32>
    %cst_25 = arith.constant 9.99999974E-5 : f32
    %55 = vector.broadcast %cst_25 : f32 to vector<8x32xf32>
    %56 = arith.addf %54, %55 : vector<8x32xf32>
    %c0_26 = arith.constant 0 : index
    %c0_27 = arith.constant 0 : index
    %57 = vector.load %arg2[%c0_26, %c0_27] : memref<8x32xf32, #tpu.memory_space<vmem>>, vector<8x32xf32>
    %58 = arith.mulf %57, %56 : vector<8x32xf32>
    %59 = arith.addf %58, %51 : vector<8x32xf32>
    %c0_28 = arith.constant 0 : index
    %c0_29 = arith.constant 0 : index
    %60 = vector.load %arg7[%c0_28, %c0_29] : memref<32x32xf32, #tpu.memory_space<vmem>>, vector<32x32xf32>
    %c0_30 = arith.constant 0 : index
    %c0_31 = arith.constant 0 : index
    %61 = vector.load %arg8[%c0_30, %c0_31] : memref<1x32xf32, #tpu.memory_space<vmem>>, vector<1x32xf32>
    %cst_32 = arith.constant dense<0.000000e+00> : vector<8x32xf32>
    %62 = tpu.matmul %59, %60, %cst_32 {dimension_numbers = #tpu.dot_dimension_numbers<[1], [0], [0], [1], [0, 0, 1, 1], [], []>} : vector<8x32xf32>, vector<32x32xf32>, vector<8x32xf32> -> vector<8x32xf32>
    %63 = vector.broadcast %61 : vector<1x32xf32> to vector<8x32xf32>
    %64 = arith.addf %62, %63 : vector<8x32xf32>
    %65 = tpu.concatenate %64, %51, %56 in 1 : vector<8x32xf32>, vector<8x32xf32>, vector<8x32xf32> -> vector<8x96xf32>
    %c0_33 = arith.constant 0 : index
    %c0_34 = arith.constant 0 : index
    %66 = vector.load %arg9[%c0_33, %c0_34] : memref<8x96xf32, #tpu.memory_space<vmem>>, vector<8x96xf32>
    tpu.vector_store %arg9[%c0_33, %c0_34], %65 {strides = array<i32>} : memref<8x96xf32, #tpu.memory_space<vmem>>, vector<8x96xf32>,
    return
  }
}

</mosaic_0001>

<bundles_post_ra>
// kernel: tpu_custom_call.1
= control target key start
LH: loop header
LB: loop body
LE: loop exit
PB: predicated region body
PF: predicated region fallthrough
CT: control target
= control target key end

     0   :  { %14 = vsyncpa [#allocation3], 0  ;;  %s1093_s0 = inlined_call_operand.hbm [shape: s8[8,8], index: 0, kind: input, shape index: {}]   ;;  %s1094_s1 = inlined_call_operand.hbm [shape: f32[8,32], index: 1, kind: input, shape index: {}]   ;;  %s1095_s2 = inlined_call_operand.hbm [shape: f32[8,32], index: 2, kind: input, shape index: {}]   ;;  %s1096_s3 = inlined_call_operand.hbm [shape: f32[1,32,32], index: 3, kind: input, shape index: {}]   ;;  %s1097_s4 = inlined_call_operand.vmem [shape: f32[1,1,32], index: 4, kind: input, shape index: {}]   ;;  %s1098_s5 = inlined_call_operand.hbm [shape: f32[32,64], index: 5, kind: input, shape index: {}]   ;;  %s1099_s6 = inlined_call_operand.vmem [shape: f32[1,64], index: 6, kind: input, shape index: {}]   ;;  %s1100_s7 = inlined_call_operand.hbm [shape: f32[32,32], index: 7, kind: input, shape index: {}]   ;;  %s1101_s8 = inlined_call_operand.vmem [shape: f32[1,32], index: 8, kind: input, shape index: {}]   ;;  %s1102_s9 = inlined_call_operand.hbm [shape: f32[8,96], index: 9, kind: output, shape index: {}]  }
   0x1   :  { %15 = vsyncpa [#allocation6], 0 }
   0x2   :  { %16 = vsyncpa [#allocation9], 0 }
   0x3   :  { %17 = vsyncpa [#allocation12], 0 }
   0x4   :  { %18 = vsyncpa [#allocation4], 0  ;;  %s877_s30 = smov [#allocation5]   ;;  %s878_s11 = smov [#allocation8]  }
   0x5   :  { %s35_s10 = sshll.u32 %s877_s30, 4  ;;  %s54_s12 = sshll.u32 %s878_s11, 4  ;;  %s36_s10 = int_to_ptr.vmem [resolvable:$true] %s35_s10  ;;  %s55_s12 = int_to_ptr.vmem [resolvable:$true] %s54_s12 }
   0x6   :  { %s735_s13 = scalar_lea.vmem %s36_s10, 128  ;;  %p740_p1 = scmp.lt.s32.totalorder %s36_s10, %s36_s10 }
   0x7   :  { %p736_p0 = scmp.ne.s32.totalorder %s36_s10, %s735_s13  ;;  %p741_p2 = scmp.lt.s32.totalorder %s735_s13, %s735_s13 }
   0x9   :  { %p742_p3 = por %p741_p2, %p740_p1 }
   0xb   :  { %p743_p4 = pnand %p742_p3, %p736_p0 }
   0xd   :  { %746 = shalt.err (!%p743_p4)
}
   0xe   :  { %38 = dma.hbm_to_vmem [thread:$0]  %s1094_s1, 128, %s36_s10, [#allocation6]  }
   0xf   :  { %s755_s16 = scalar_lea.vmem %s55_s12, 512  ;;  %p760_p6 = scmp.lt.s32.totalorder %s55_s12, %s55_s12 }
  0x10   :  { %p756_p5 = scmp.ne.s32.totalorder %s55_s12, %s755_s16  ;;  %p761_p7 = scmp.lt.s32.totalorder %s755_s16, %s755_s16 }
  0x12   :  { %p762_p8 = por %p761_p7, %p760_p6 }
  0x14   :  { %p763_p9 = pnand %p762_p8, %p756_p5 }
  0x16   :  { %766 = shalt.err (!%p763_p9)
}
  0x17   :  { %s879_s17 = smov 128   ;;  %s880_s18 = smov 8  }
  0x18   :  { %60 = dma.hbm_to_vmem [thread:$0]  %s1096_s3, 512, %s55_s12, [#allocation9], %s879_s17, %s879_s17, %s880_s18  }
  0x19   :  { %s881_s21 = smov [#allocation2]   ;;  %s882_s23 = smov [#allocation7]  }
  0x1a   :  { %s25_s22 = sshll.u32 %s881_s21, 4  ;;  %s45_s1 = sshll.u32 %s882_s23, 4  ;;  %s26_s22 = int_to_ptr.vmem [resolvable:$true] %s25_s22  ;;  %s46_s1 = int_to_ptr.vmem [resolvable:$true] %s45_s1 }
  0x1b   :  { %s775_s24 = scalar_lea.vmem %s26_s22, 32  ;;  %p780_p11 = scmp.lt.s32.totalorder %s26_s22, %s26_s22 }
  0x1c   :  { %p776_p10 = scmp.ne.s32.totalorder %s26_s22, %s775_s24  ;;  %p781_p12 = scmp.lt.s32.totalorder %s775_s24, %s775_s24 }
  0x1e   :  { %p782_p13 = por %p781_p12, %p780_p11 }
  0x20   :  { %p783_p0 = pnand %p782_p13, %p776_p10 }
  0x22   :  { %786 = shalt.err (!%p783_p0)
}
  0x23   :  { %28 = dma.hbm_to_vmem [thread:$0]  %s1093_s0, 32, %s26_s22, [#allocation3]  }
  0x24   :  { %s795_s27 = scalar_lea.vmem %s46_s1, 128  ;;  %p800_p2 = scmp.lt.s32.totalorder %s46_s1, %s46_s1 }
  0x25   :  { %p796_p1 = scmp.ne.s32.totalorder %s46_s1, %s795_s27  ;;  %p801_p3 = scmp.lt.s32.totalorder %s795_s27, %s795_s27 }
  0x27   :  { %p802_p4 = por %p801_p3, %p800_p2 }
  0x29   :  { %p803_p5 = pnand %p802_p4, %p796_p1 }
  0x2b   :  { %806 = shalt.err (!%p803_p5)
}
  0x2c   :  { %48 = dma.hbm_to_vmem [thread:$0]  %s1095_s2, 128, %s46_s1, [#allocation6]  }
  0x2d   :  { %s883_s29 = smov [#allocation10]   ;;  %s884_s10 = smov [#allocation11]  }
  0x2e   :  { %s68_s30 = sshll.u32 %s883_s29, 4  ;;  %s82_s11 = sshll.u32 %s884_s10, 4  ;;  %s69_s30 = int_to_ptr.vmem [resolvable:$true] %s68_s30  ;;  %s83_s11 = int_to_ptr.vmem [resolvable:$true] %s82_s11 }
  0x2f   :  { %s815_s12 = scalar_lea.vmem %s69_s30, 512  ;;  %p820_p7 = scmp.lt.s32.totalorder %s69_s30, %s69_s30 }
  0x30   :  { %p816_p6 = scmp.ne.s32.totalorder %s69_s30, %s815_s12  ;;  %p821_p8 = scmp.lt.s32.totalorder %s815_s12, %s815_s12 }
  0x32   :  { %p822_p9 = por %p821_p8, %p820_p7 }
  0x34   :  { %p823_p10 = pnand %p822_p9, %p816_p6 }
  0x36   :  { %826 = shalt.err (!%p823_p10)
}
  0x37   :  { %74 = dma.hbm_to_vmem [thread:$0]  %s1098_s5, 512, %s69_s30, [#allocation9], %s879_s17, %s879_s17, %s880_s18  }
  0x38   :  { %s835_s2 = scalar_lea.vmem %s83_s11, 512  ;;  %p840_p12 = scmp.lt.s32.totalorder %s83_s11, %s83_s11 }
  0x39   :  { %p836_p11 = scmp.ne.s32.totalorder %s83_s11, %s835_s2  ;;  %p841_p13 = scmp.lt.s32.totalorder %s835_s2, %s835_s2 }
  0x3b   :  { %p842_p0 = por %p841_p13, %p840_p12 }
  0x3d   :  { %p843_p1 = pnand %p842_p0, %p836_p11 }
  0x3f   :  { %846 = shalt.err (!%p843_p1)
}
  0x40   :  { %88 = dma.hbm_to_vmem [thread:$0]  %s1100_s7, 512, %s83_s11, [#allocation12], %s879_s17, %s879_s17, %s880_s18  }
  0x41   :  { %867 = dma.done.wait [#allocation3], 32  }
  0x42   :  { %868 = vsyncadd [#allocation3], 4294967264 }
  0x43   :  { %869 = dma.done.wait [#allocation6], 256  }
  0x44   :  { %870 = vsyncadd [#allocation6], 4294967040 }
  0x45   :  { %871 = dma.done.wait [#allocation9], 1024  }
  0x46   :  { %872 = vsyncadd [#allocation9], 4294966272 }
  0x47   :  { %873 = dma.done.wait [#allocation12], 512  }
  0x48   :  { %874 = vsyncadd [#allocation12], 4294966784  ;;  %v119_v0 = vlaneseq  ;;  %v109_v2 = vld [vmem:[#allocation2] sm:$0x3]  ;;  %v885_v8 = vmov -3e+38  }
  0x49   :  { %v110_v3 = vunpack.c.0.s8 %v109_v2  ;;  %v278_v22 = vld [vmem:[#allocation8 + $0x18] sm:$0xff]  ;;  %v886_v23 = vmov 0.0   ;;  %v277_v24 = vld [vmem:[#allocation8 + $0x10] sm:$0xff]  ;;  %vm113_vm1 = vcmask 64512   ;;  %v276_v26 = vld [vmem:[#allocation8 + $0x8] sm:$0xff]  ;;  %vm887_vm2 = vmmov 0  }
  0x4a   :  { %v120_v1 = vshrl.u32 %v119_v0, 7  ;;  %678 = vmatprep.subr.mxu0 %v886_v23  ;;  %689 = vmatprep.subr.mxu1 %v886_v23  ;;  %v275_v27 = vld [vmem:[#allocation8] sm:$0xff]  ;;  %v984_v31 = vld [vmem:[#allocation5] sm:$0xff]  ;;  %vm183_vm3 = vcmask 261120   ;;  %vm258_vm4 = vcmask 1041409   ;;  %vm260_vm5 = vcmask 1042434  }
  0x4b   :  { %vm111_vm0 = vcmp.gt.s32.totalorder %v110_v3, 0  ;;  %679 = vmatpush3.msra.mxu0 %v278_v22  ;;  %686 = vmatprep.mubr.msk.f32.mxu0 %vm887_vm2, %v886_v23  ;;  %vm262_vm6 = vcmask 1043459   ;;  %vm264_vm7 = vcmask 1044484   ;;  %vm266_vm8 = vcmask 1045509   ;;  %s888_s17 = smov 96   ;;  %s889_s18 = smov 32  }
  0x4c   :  { %v121_v4 = vsub.s32 0, %v120_v1  ;;  %v135_v5 = vsub.s32 2, %v120_v1  ;;  %v128_v6 = vsub.s32 1, %v120_v1  ;;  %v142_v7 = vsub.s32 3, %v120_v1  ;;  %680 = vmatprep.subr.mxu0 %v886_v23  ;;  %697 = vmatprep.mubr.msk.f32.mxu1 %vm887_vm2, %v886_v23  ;;  %s890_s20 = smov [#allocation13]  }
  0x4d   :  { %v112_v9 = vsel %vm111_vm0, 0.0, %v885_v8  ;;  %v149_v14 = vsub.s32 4, %v120_v1  ;;  %v156_v15 = vsub.s32 5, %v120_v1  ;;  %v163_v18 = vsub.s32 6, %v120_v1  ;;  %681 = vmatpush3.msra.mxu0 %v277_v24  ;;  %s645_s21 = sshll.u32 %s890_s20, 4  ;;  %s646_s21 = int_to_ptr.vmem [resolvable:$true] %s645_s21 }
  0x4e   :  { %v122_v10 = vrot.slane %v112_v9, %v121_v4  ;;  %v136_v11 = vrot.slane %v112_v9, %v135_v5  ;;  %v129_v12 = vrot.slane %v112_v9, %v128_v6  ;;  %v143_v13 = vrot.slane %v112_v9, %v142_v7  ;;  %682 = vmatprep.subr.mxu0 %v886_v23  ;;  %s847_s22 = scalar_lea.vmem %s646_s21, 128  ;;  %p852_p3 = scmp.lt.s32.totalorder %s646_s21, %s646_s21 }
  0x4f   :  { %v150_v16 = vrot.slane %v112_v9, %v149_v14  ;;  %v157_v17 = vrot.slane %v112_v9, %v156_v15  ;;  %v170_v19 = vsub.s32 7, %v120_v1  ;;  %v164_v20 = vrot.slane %v112_v9, %v163_v18  ;;  %683 = vmatpush3.msra.mxu0 %v276_v26  ;;  %p848_p2 = scmp.ne.s32.totalorder %s646_s21, %s847_s22  ;;  %p853_p4 = scmp.lt.s32.totalorder %s847_s22, %s847_s22 }
  0x50   :  { %124 = vbcast.lane.b32.xlu0 %v122_v10, 256  ;;  %138 = vbcast.lane.b32.xlu1 %v136_v11, 256  ;;  %v114_v25 = vsel %vm113_vm1, %v112_v9, -inf  ;;  %vm268_vm9 = vcmask 1046534   ;;  %vm270_vm10 = vcmask 1047559   ;;  %vm635_vm12 = vcmask 523264  }
  0x51   :  { %v171_v21 = vrot.slane %v112_v9, %v170_v19  ;;  %684 = vmatprep.subr.mxu0 %v886_v23  ;;  %vm637_vm13 = vcmask 785408   ;;  %p854_p5 = por %p853_p4, %p852_p3 }
  0x52   :  { %685 = vmatpush3.msra.mxu0 %v275_v27 }
  0x53   :  { %700 = vmatprep.subr.mxu0 %v886_v23  ;;  %p855_p6 = pnand %p854_p5, %p848_p2 }
  0x54   :  { %131 = vbcast.lane.b32.xlu0 %v129_v12, 256  ;;  %145 = vbcast.lane.b32.xlu1 %v143_v13, 256 }
  0x58   :  { %152 = vbcast.lane.b32.xlu0 %v150_v16, 256  ;;  %159 = vbcast.lane.b32.xlu1 %v157_v17, 256 }
  0x5c   :  { %166 = vbcast.lane.b32.xlu0 %v164_v20, 256  ;;  %173 = vbcast.lane.b32.xlu1 %v171_v21, 256 }
  0x7b   :  { %115 = vmax.xlane.f32.xlu0 %v114_v25 }
  0xc2   :  { %v978_v28 = vpop.permute.xlu0 %124  ;;  %v980_v29 = vpop.permute.xlu1 %138 }
  0xc3   :  { %v175_v34 = vadd.f32 %v978_v28, %v984_v31  ;;  %v177_v35 = vadd.f32 %v980_v29, %v984_v31 }
  0xc5   :  { %v184_v38 = vsel %vm183_vm3, %v175_v34, -inf  ;;  %v198_v40 = vsel %vm183_vm3, %v177_v35, -inf }
  0xc6   :  { %v982_v30 = vpop.permute.xlu0 %131  ;;  %v988_v33 = vpop.permute.xlu1 %145  ;;  %v185_v43 = vrot.slane %v184_v38, 4  ;;  %v199_v45 = vrot.slane %v198_v40, 4 }
  0xc7   :  { %v176_v32 = vadd.f32 %v982_v30, %v984_v31  ;;  %v178_v39 = vadd.f32 %v988_v33, %v984_v31 }
  0xc8   :  { %v186_v50 = vmax.f32 %v184_v38, %v185_v43  ;;  %v200_v55 = vmax.f32 %v198_v40, %v199_v45 }
  0xc9   :  { %v191_v36 = vsel %vm183_vm3, %v176_v32, -inf  ;;  %v205_v46 = vsel %vm183_vm3, %v178_v39, -inf }
  0xca   :  { %v995_v37 = vpop.permute.xlu0 %152  ;;  %v192_v41 = vrot.slane %v191_v36, 4  ;;  %v1001_v42 = vpop.permute.xlu1 %159  ;;  %v206_v51 = vrot.slane %v205_v46, 4  ;;  %v187_v60 = vrot.slane %v186_v50, 2  ;;  %v201_v63 = vrot.slane %v200_v55, 2 }
  0xcb   :  { %v179_v44 = vadd.f32 %v995_v37, %v984_v31  ;;  %v180_v49 = vadd.f32 %v1001_v42, %v984_v31 }
  0xcc   :  { %v193_v48 = vmax.f32 %v191_v36, %v192_v41  ;;  %v207_v61 = vmax.f32 %v205_v46, %v206_v51  ;;  %v188_v5 = vmax.f32 %v186_v50, %v187_v60  ;;  %v202_v7 = vmax.f32 %v200_v55, %v201_v63 }
  0xcd   :  { %v212_v52 = vsel %vm183_vm3, %v179_v44, -inf  ;;  %v219_v58 = vsel %vm183_vm3, %v180_v49, -inf }
  0xce   :  { %v1006_v47 = vpop.permute.xlu0 %166  ;;  %v1013_v54 = vpop.permute.xlu1 %173  ;;  %v194_v56 = vrot.slane %v193_v48, 2  ;;  %v213_v57 = vrot.slane %v212_v52, 4  ;;  %v220_v1 = vrot.slane %v219_v58, 4  ;;  %v208_v6 = vrot.slane %v207_v61, 2 }
  0xcf   :  { %v181_v53 = vadd.f32 %v1006_v47, %v984_v31  ;;  %v182_v59 = vadd.f32 %v1013_v54, %v984_v31  ;;  %v189_v13 = vrot.slane %v188_v5, 1  ;;  %v203_v15 = vrot.slane %v202_v7, 1 }
  0xd0   :  { %v195_v0 = vmax.f32 %v193_v48, %v194_v56  ;;  %v214_v2 = vmax.f32 %v212_v52, %v213_v57  ;;  %v221_v9 = vmax.f32 %v219_v58, %v220_v1  ;;  %v209_v14 = vmax.f32 %v207_v61, %v208_v6  ;;  %v453_v1 = vld [vmem:[#allocation10 + $0x18] sm:$0xff] }
  0xd1   :  { %v226_v62 = vsel %vm183_vm3, %v181_v53, -inf  ;;  %v233_v4 = vsel %vm183_vm3, %v182_v59, -inf  ;;  %v190_v21 = vmax.f32 %v188_v5, %v189_v13  ;;  %v204_v24 = vmax.f32 %v202_v7, %v203_v15  ;;  %690 = vmatpush3.msra.mxu1 %v453_v1 }
  0xd2   :  { %v227_v3 = vrot.slane %v226_v62, 4  ;;  %v196_v8 = vrot.slane %v195_v0, 1  ;;  %v234_v10 = vrot.slane %v233_v4, 4  ;;  %v215_v11 = vrot.slane %v214_v2, 2  ;;  %691 = vmatprep.subr.mxu1 %v886_v23 }
  0xd3   :  { %v222_v17 = vrot.slane %v221_v9, 2  ;;  %v210_v22 = vrot.slane %v209_v14, 1  ;;  %v240_v35 = vmax.f32 %v190_v21, -3e+38  ;;  %v242_v38 = vmax.f32 %v204_v24, -3e+38 }
  0xd4   :  { %v228_v12 = vmax.f32 %v226_v62, %v227_v3  ;;  %v197_v16 = vmax.f32 %v195_v0, %v196_v8  ;;  %v235_v18 = vmax.f32 %v233_v4, %v234_v10  ;;  %v216_v19 = vmax.f32 %v214_v2, %v215_v11  ;;  %v452_v2 = vld [vmem:[#allocation10 + $0x10] sm:$0xff]  ;;  %v451_v3 = vld [vmem:[#allocation10 + $0x8] sm:$0xff]  ;;  %v450_v4 = vld [vmem:[#allocation10] sm:$0xff] }
  0xd5   :  { %v223_v26 = vmax.f32 %v221_v9, %v222_v17  ;;  %v211_v36 = vmax.f32 %v209_v14, %v210_v22  ;;  %692 = vmatpush3.msra.mxu1 %v452_v2 }
  0xd6   :  { %v229_v20 = vrot.slane %v228_v12, 2  ;;  %v241_v25 = vmax.f32 %v197_v16, -3e+38  ;;  %v236_v27 = vrot.slane %v235_v18, 2  ;;  %v217_v32 = vrot.slane %v216_v19, 1  ;;  %693 = vmatprep.subr.mxu1 %v886_v23 }
  0xd7   :  { %v224_v40 = vrot.slane %v223_v26, 1  ;;  %v243_v45 = vmax.f32 %v211_v36, -3e+38  ;;  %694 = vmatpush3.msra.mxu1 %v451_v3 }
  0xd8   :  { %v230_v34 = vmax.f32 %v228_v12, %v229_v20  ;;  %v259_v39 = vsel %vm258_vm4, %v241_v25, %v240_v35  ;;  %v237_v41 = vmax.f32 %v235_v18, %v236_v27  ;;  %v218_v43 = vmax.f32 %v216_v19, %v217_v32  ;;  %695 = vmatprep.subr.mxu1 %v886_v23 }
  0xd9   :  { %v261_v46 = vsel %vm260_vm5, %v242_v38, %v259_v39  ;;  %v225_v48 = vmax.f32 %v223_v26, %v224_v40  ;;  %696 = vmatpush3.msra.mxu1 %v450_v4 }
  0xda   :  { %v231_v44 = vrot.slane %v230_v34, 1  ;;  %v238_v49 = vrot.slane %v237_v41, 1  ;;  %v244_v50 = vmax.f32 %v218_v43, -3e+38  ;;  %v263_v52 = vsel %vm262_vm6, %v243_v45, %v261_v46 }
  0xdb   :  { %v245_v53 = vmax.f32 %v225_v48, -3e+38 }
  0xdc   :  { %v232_v51 = vmax.f32 %v230_v34, %v231_v44  ;;  %v239_v55 = vmax.f32 %v237_v41, %v238_v49  ;;  %v265_v57 = vsel %vm264_vm7, %v244_v50, %v263_v52 }
  0xdd   :  { %v267_v59 = vsel %vm266_vm8, %v245_v53, %v265_v57 }
  0xde   :  { %v246_v56 = vmax.f32 %v232_v51, -3e+38  ;;  %v247_v58 = vmax.f32 %v239_v55, -3e+38 }
  0xe0   :  { %v269_v60 = vsel %vm268_vm9, %v246_v56, %v267_v59 }
  0xe1   :  { %v271_v62 = vsel %vm270_vm10, %v247_v58, %v269_v60 }
 0x104   :  { %v1026_v61 = vpop.xlane.xlu0 %115 }
 0x105   :  { %vm117_vm11 = vcmp.ge.f32.partialorder %v1026_v61, 0.0  ;;  %v659_v61 = vld [vmem:[%s1099_s6] ss:$0 sm:$0xff] }
 0x106   :  { %v273_v63 = vsel %vm117_vm11, %v271_v62, 0.0 }
 0x107   :  { %v274_v0 = vadd.f32 %v273_v63, %v984_v31  ;;  %v657_v31 = vld [vmem:[%s1097_s4] ss:$0 sm:$0xff] }
 0x109   :  { %687 = vmatmul.mubr.msk.f32.vlgmr.msra.gmra.mxu0 %vm183_vm3, %v274_v0 }
 0x10a   :  { %708 = vmatprep.mubr.msk.f32.mxu0 %vm887_vm2, %v886_v23 }
 0x1c9   :  { %v355_v5 = vpop.f32.mrf.mxu0 }
 0x1ca   :  { %v356_v6 = vadd.f32 %v657_v31, %v355_v5 }
 0x1cb   :  { %v688_v7 = vpop.f32.mrf.mxu0 }
 0x1cc   :  { %725 = vtanh.f32 %v356_v6 }
 0x1d9   :  { %v1042_v8 = vpop.eup %725 }
 0x1da   :  { %v360_v9 = vadd.f32 %v1042_v8, %v978_v28  ;;  %v361_v10 = vadd.f32 %v1042_v8, %v982_v30  ;;  %v362_v11 = vadd.f32 %v1042_v8, %v980_v29  ;;  %v363_v12 = vadd.f32 %v1042_v8, %v988_v33 }
 0x1db   :  { %v364_v13 = vadd.f32 %v1042_v8, %v995_v37  ;;  %v365_v14 = vadd.f32 %v1042_v8, %v1001_v42  ;;  %v366_v15 = vadd.f32 %v1042_v8, %v1006_v47  ;;  %v367_v28 = vadd.f32 %v1042_v8, %v1013_v54 }
 0x1dc   :  { %v368_v30 = vsel %vm183_vm3, %v360_v9, -inf  ;;  %v375_v16 = vsel %vm183_vm3, %v361_v10, -inf  ;;  %v382_v29 = vsel %vm183_vm3, %v362_v11, -inf  ;;  %v389_v33 = vsel %vm183_vm3, %v363_v12, -inf }
 0x1dd   :  { %v369_v17 = vrot.slane %v368_v30, 4  ;;  %v376_v18 = vrot.slane %v375_v16, 4  ;;  %v383_v37 = vrot.slane %v382_v29, 4  ;;  %v390_v19 = vrot.slane %v389_v33, 4 }
 0x1de   :  { %v396_v42 = vsel %vm183_vm3, %v364_v13, -inf  ;;  %v403_v20 = vsel %vm183_vm3, %v365_v14, -inf  ;;  %v410_v47 = vsel %vm183_vm3, %v366_v15, -inf  ;;  %v417_v54 = vsel %vm183_vm3, %v367_v28, -inf }
 0x1df   :  { %v370_v21 = vmax.f32 %v368_v30, %v369_v17  ;;  %v377_v22 = vmax.f32 %v375_v16, %v376_v18  ;;  %v384_v24 = vmax.f32 %v382_v29, %v383_v37  ;;  %v391_v25 = vmax.f32 %v389_v33, %v390_v19 }
 0x1e0   :  { %v397_v26 = vrot.slane %v396_v42, 4  ;;  %v404_v27 = vrot.slane %v403_v20, 4  ;;  %v411_v32 = vrot.slane %v410_v47, 4  ;;  %v418_v34 = vrot.slane %v417_v54, 4 }
 0x1e1   :  { %v371_v35 = vrot.slane %v370_v21, 2  ;;  %v378_v36 = vrot.slane %v377_v22, 2  ;;  %v385_v38 = vrot.slane %v384_v24, 2  ;;  %v392_v39 = vrot.slane %v391_v25, 2 }
 0x1e2   :  { %v398_v40 = vmax.f32 %v396_v42, %v397_v26  ;;  %v405_v41 = vmax.f32 %v403_v20, %v404_v27  ;;  %v412_v43 = vmax.f32 %v410_v47, %v411_v32  ;;  %v419_v44 = vmax.f32 %v417_v54, %v418_v34 }
 0x1e3   :  { %v372_v45 = vmax.f32 %v370_v21, %v371_v35  ;;  %v379_v46 = vmax.f32 %v377_v22, %v378_v36  ;;  %v386_v48 = vmax.f32 %v384_v24, %v385_v38  ;;  %v393_v49 = vmax.f32 %v391_v25, %v392_v39  ;;  %v546_v21 = vld [vmem:[#allocation11 + $0x18] sm:$0xff]  ;;  %v545_v22 = vld [vmem:[#allocation11 + $0x10] sm:$0xff]  ;;  %v544_v24 = vld [vmem:[#allocation11 + $0x8] sm:$0xff] }
 0x1e4   :  { %v399_v50 = vrot.slane %v398_v40, 2  ;;  %v406_v51 = vrot.slane %v405_v41, 2  ;;  %v413_v52 = vrot.slane %v412_v43, 2  ;;  %v420_v53 = vrot.slane %v419_v44, 2  ;;  %701 = vmatpush3.msra.mxu0 %v546_v21  ;;  %v543_v25 = vld [vmem:[#allocation11] sm:$0xff]  ;;  %v536_v35 = vld [vmem:[#allocation7] sm:$0xff] }
 0x1e5   :  { %v373_v55 = vrot.slane %v372_v45, 1  ;;  %v380_v56 = vrot.slane %v379_v46, 1  ;;  %v387_v57 = vrot.slane %v386_v48, 1  ;;  %v394_v58 = vrot.slane %v393_v49, 1  ;;  %702 = vmatprep.subr.mxu0 %v886_v23 }
 0x1e6   :  { %v400_v59 = vmax.f32 %v398_v40, %v399_v50  ;;  %v407_v60 = vmax.f32 %v405_v41, %v406_v51  ;;  %v414_v62 = vmax.f32 %v412_v43, %v413_v52  ;;  %v421_v63 = vmax.f32 %v419_v44, %v420_v53  ;;  %703 = vmatpush3.msra.mxu0 %v545_v22 }
 0x1e7   :  { %v374_v0 = vmax.f32 %v372_v45, %v373_v55  ;;  %v381_v1 = vmax.f32 %v379_v46, %v380_v56  ;;  %v388_v2 = vmax.f32 %v386_v48, %v387_v57  ;;  %v395_v3 = vmax.f32 %v393_v49, %v394_v58  ;;  %704 = vmatprep.subr.mxu0 %v886_v23 }
 0x1e8   :  { %v401_v4 = vrot.slane %v400_v59, 1  ;;  %v408_v31 = vrot.slane %v407_v60, 1  ;;  %v415_v5 = vrot.slane %v414_v62, 1  ;;  %v422_v6 = vrot.slane %v421_v63, 1  ;;  %705 = vmatpush3.msra.mxu0 %v544_v24 }
 0x1e9   :  { %v424_v7 = vmax.f32 %v374_v0, -3e+38  ;;  %v425_v9 = vmax.f32 %v381_v1, -3e+38  ;;  %v426_v10 = vmax.f32 %v388_v2, -3e+38  ;;  %706 = vmatprep.subr.mxu0 %v886_v23 }
 0x1ea   :  { %v402_v11 = vmax.f32 %v400_v59, %v401_v4  ;;  %v409_v12 = vmax.f32 %v407_v60, %v408_v31  ;;  %v416_v13 = vmax.f32 %v414_v62, %v415_v5  ;;  %v423_v14 = vmax.f32 %v421_v63, %v422_v6  ;;  %707 = vmatpush3.msra.mxu0 %v543_v25  ;;  %v661_v23 = vld [vmem:[%s1101_s8] ss:$0 sm:$0xff] }
 0x1eb   :  { %v427_v15 = vmax.f32 %v395_v3, -3e+38  ;;  %v440_v28 = vsel %vm258_vm4, %v425_v9, %v424_v7 }
 0x1ec   :  { %v428_v30 = vmax.f32 %v402_v11, -3e+38  ;;  %v441_v16 = vsel %vm260_vm5, %v426_v10, %v440_v28  ;;  %v429_v29 = vmax.f32 %v409_v12, -3e+38  ;;  %v430_v17 = vmax.f32 %v416_v13, -3e+38 }
 0x1ed   :  { %v442_v33 = vsel %vm262_vm6, %v427_v15, %v441_v16  ;;  %v431_v37 = vmax.f32 %v423_v14, -3e+38 }
 0x1ee   :  { %v443_v18 = vsel %vm264_vm7, %v428_v30, %v442_v33 }
 0x1ef   :  { %v444_v19 = vsel %vm266_vm8, %v429_v29, %v443_v18 }
 0x1f0   :  { %v445_v42 = vsel %vm268_vm9, %v430_v17, %v444_v19 }
 0x1f1   :  { %v446_v20 = vsel %vm270_vm10, %v431_v37, %v445_v42 }
 0x1f2   :  { %v448_v47 = vsel %vm117_vm11, %v446_v20, 0.0 }
 0x1f3   :  { %v449_v54 = vadd.f32 %v1042_v8, %v448_v47 }
 0x1f5   :  { %698 = vmatmul.mubr.msk.f32.vlgmr.msra.gmra.mxu1 %vm183_vm3, %v449_v54 }
 0x2b5   :  { %v530_v8 = vpop.f32.mrf.mxu1 }
 0x2b6   :  { %v531_v26 = vadd.f32 %v659_v61, %v530_v8 }
 0x2b7   :  { %v699_v27 = vpop.f32.mrf.mxu1 }
 0x2b8   :  { %v534_v32 = vmax.f32 %v531_v26, 0.0 }
 0x2ba   :  { %v535_v34 = vadd.f32 0.0001, %v534_v32 }
 0x2bc   :  { %538 = vrot.lane.b32.xlu1 %v535_v34, %s888_s17 }
 0x2c0   :  { %628 = vrot.lane.b32.xlu1 %v531_v26, %s889_s18 }
 0x2c4   :  { %631 = vrot.lane.b32.xlu1 %v535_v34, %s889_s18 }
 0x32e   :  { %v539_v36 = vpop.permute.xlu1 %538 }
 0x32f   :  { %v541_v38 = vmul.f32 %v539_v36, %v536_v35 }
 0x331   :  { %v542_v39 = vadd.f32 %v541_v38, %v531_v26 }
 0x332   :  { %v629_v40 = vpop.permute.xlu1 %628 }
 0x333   :  { %709 = vmatmul.mubr.msk.f32.vlgmr.msra.gmra.mxu0 %vm183_vm3, %v542_v39 }
 0x336   :  { %v632_v45 = vpop.permute.xlu1 %631 }
 0x3f3   :  { %v623_v41 = vpop.f32.mrf.mxu0 }
 0x3f4   :  { %v624_v43 = vadd.f32 %v661_v23, %v623_v41 }
 0x3f5   :  { %v710_v44 = vpop.f32.mrf.mxu0 }
 0x3f6   :  { %v634_v46 = vsel %vm183_vm3, %v624_v43, %v629_v40 }
 0x3f7   :  { %v636_v48 = vsel %vm635_vm12, %v634_v46, %v632_v45 }
 0x3f8   :  { %638 = vst.msk [vmem:[#allocation13] sm:$0xff] %vm637_vm13, %v636_v48 }
 0x3f9   :  { %858 = shalt.err (!%p855_p6)
}
 0x3fa   :  { %648 = dma.vmem_to_hbm [thread:$0]  %s646_s21, 128, %s1102_s9, [#allocation4]  }
 0x3fb   :  { %875 = dma.done.wait [#allocation4], 128  }
 0x3fc   :  { %876 = vsyncadd [#allocation4], 4294967168 }
 0x3fd   :  { %652 = vsyncpa [#allocation3], 1 }
 0x3fe   :  { %653 = vsyncpa [#allocation6], 1 }
 0x3ff   :  { %654 = vsyncpa [#allocation9], 1 }
 0x400   :  { %655 = vsyncpa [#allocation12], 1 }
 0x401   :  { %656 = vsyncpa [#allocation4], 1 }

</bundles_post_ra>
